<compile_context>
chip_gen: v6e
topology: v6e:2x2x1
jax: 0.10.0
libtpu: 0.0.40
codegen_flags: <defaults>
</compile_context>

<pallas_src>
import jax
import jax.numpy as jnp
from jax.experimental import pallas as pl
from jax.experimental.pallas import tpu as pltpu

# ----------------------------- configuration --------------------------------
IMG_C, IMG_H, IMG_W = 3, 32, 32          # small synthetic image (real CLIP: 3x224x224)
PATCH = 8
N_PATCH = (IMG_H // PATCH) * (IMG_W // PATCH)      # 16 patches / frame
PATCH_DIM = IMG_C * PATCH * PATCH                  # 192
HIDDEN = 128
EMBED = 128                                         # shared embed dim (real: 512)
N_FRAMES = 4

N_CLIP_ROWS = 2 * N_PATCH                           # image_0 + image_1 patches  (32)
N_VIDEO_ROWS = N_FRAMES * N_PATCH                   # all video-frame patches    (64)
TOTAL_ROWS = N_CLIP_ROWS + N_VIDEO_ROWS             # 96

CLIP_MEAN = jnp.array([0.48145466, 0.4578275, 0.40821073], jnp.float32)
CLIP_STD = jnp.array([0.26862954, 0.26130258, 0.27577711], jnp.float32)


# ------------------------------ Pallas kernel --------------------------------
def fused_clip_kernel(x_ref, w1_ref, b1_ref, w2_ref, pc_ref, pv_ref, o_ref):
    """Fused forward.

    x_ref  : (96, 192) f32 patches of all 6 images in [-1, 1]
             rows  0..31  -> image_0, image_1 (CLIP branch)
             rows 32..95  -> 4 video frames   (X-CLIP branch)
    w1_ref : (192, 256) bf16 = [w1_clip | w1_xclip] with the processor
             normalization folded in (see fold_norm_into_encoder).
    b1_ref : (1, 256) f32 merged bias.
    w2_ref : (128, 256) bf16 = [w2_clip | w2_xclip] stacked on the output axis.
    pc_ref : (8, 32) f32 pooling matrix (row 0 -> image_0 mean, row 1 -> image_1 mean).
    pv_ref : (8, 64) f32 pooling matrix (row 2 -> video mean).
    o_ref  : (8, 128) f32 lane-dense output; row 0 = sim(image_0, video),
             row 1 = sim(image_1, video), broadcast across lanes.
    """
    x = x_ref[...]
    # denormalize_image: ((x+1)*255/2).clamp(0,255).int(); floor == trunc since >= 0.
    # Element-wise math stays f32 (v5e has no bf16 VPU/EUP); cast only matmul operands.
    q = jnp.floor(jnp.clip((x + 1.0) * 127.5, 0.0, 255.0))
    q = q.astype(jnp.bfloat16)                     # integers 0..255 are exact in bf16

    # one merged patch-embed matmul: (96,192)@(192,256) bf16 x bf16 -> f32 on the MXU
    h = jnp.dot(q, w1_ref[...], preferred_element_type=jnp.float32) + b1_ref[...]

    # GELU only on the consumed halves (halves VPU/EUP work vs. the merged tile)
    hc = jax.nn.gelu(h[0:N_CLIP_ROWS, 0:HIDDEN])                    # (32, HIDDEN)
    hx = jax.nn.gelu(h[N_CLIP_ROWS:TOTAL_ROWS, HIDDEN:2 * HIDDEN])  # (64, HIDDEN)

    # mean pooling as two tiny MXU matmuls -> (8, HIDDEN) pooled tile
    # rows: 0 = image_0 mean, 1 = image_1 mean, 2 = video mean, 3..7 = zero pad
    pooled = (jnp.dot(pc_ref[...], hc, preferred_element_type=jnp.float32)
              + jnp.dot(pv_ref[...], hx, preferred_element_type=jnp.float32))

    # one stacked projection matmul: (8,128) @ (128,256)
    proj = jnp.dot(pooled.astype(jnp.bfloat16), w2_ref[...],
                   preferred_element_type=jnp.float32)
    feats = proj[:, 0:EMBED]                  # rows 0,1 = CLIP image embeds
    video = proj[2:3, EMBED:2 * EMBED]        # (1, EMBED) X-CLIP video embed

    # F.cosine_similarity: dot / (max(||a||,eps) * max(||b||,eps)), eps = 1e-8.
    # rsqrt(max(n^2, eps^2)) == 1 / max(n, eps); rsqrt runs on the EUP.
    dots = jnp.sum(feats * video, axis=-1, keepdims=True)                   # (8, 1)
    na2 = jnp.sum(feats * feats, axis=-1, keepdims=True)                    # (8, 1)
    nb2 = jnp.sum(video * video, axis=-1, keepdims=True)                    # (1, 1)
    eps2 = jnp.float32(1e-16)
    sims = (dots
            * jax.lax.rsqrt(jnp.maximum(na2, eps2))
            * jax.lax.rsqrt(jnp.maximum(nb2, eps2)))                        # (8, 1)

    o_ref[...] = jnp.broadcast_to(sims, (8, EMBED))


# ------------------------------ kernel wrapper --------------------------------
_VMEM_SPEC = pl.BlockSpec(memory_space=pltpu.MemorySpace.VMEM)


def _cost_estimate():
    flops = (2 * TOTAL_ROWS * PATCH_DIM * (2 * HIDDEN)         # merged patch embed
             + 2 * 8 * N_CLIP_ROWS * HIDDEN                    # CLIP pooling matmul
             + 2 * 8 * N_VIDEO_ROWS * HIDDEN                   # video pooling matmul
             + 2 * 8 * HIDDEN * (2 * EMBED))                   # stacked projection
    transcendentals = TOTAL_ROWS * HIDDEN + 16                 # GELU tanh + rsqrt
    bytes_accessed = (TOTAL_ROWS * PATCH_DIM * 4               # patches (f32)
                      + PATCH_DIM * 2 * HIDDEN * 2             # w1 (bf16)
                      + 2 * HIDDEN * 4                         # b1 (f32)
                      + HIDDEN * 2 * EMBED * 2                 # w2 (bf16)
                      + 8 * N_CLIP_ROWS * 4 + 8 * N_VIDEO_ROWS * 4  # pooling mats
                      + 8 * EMBED * 4)                         # output
    return pl.CostEstimate(flops=flops, transcendentals=transcendentals,
                           bytes_accessed=bytes_accessed)


def fused_forward_call(patches, w1, b1, w2, pc, pv):
    return pl.pallas_call(
        fused_clip_kernel,
        out_shape=jax.ShapeDtypeStruct((8, EMBED), jnp.float32),
        in_specs=[_VMEM_SPEC] * 6,
        out_specs=_VMEM_SPEC,
        cost_estimate=_cost_estimate(),
    )(patches, w1, b1, w2, pc, pv)


# ------------------------------ glue (plain JAX) ------------------------------
def patchify_batch(imgs_nchw):
    """(N, C, H, W) -> (N*N_PATCH, PATCH_DIM); PATCH_DIM layout is (c, ph, pw)."""
    n = imgs_nchw.shape[0]
    x = imgs_nchw.reshape(n, IMG_C, IMG_H // PATCH, PATCH, IMG_W // PATCH, PATCH)
    x = x.transpose(0, 2, 4, 1, 3, 5)
    return x.reshape(n * N_PATCH, PATCH_DIM)


def fold_norm_into_encoder(w1, b1):
    """Fold (q/255 - mean)/std into the patch-embed weights (per channel column)."""
    ch = jnp.arange(PATCH_DIM) // (PATCH * PATCH)        # channel of each column
    a = 1.0 / (255.0 * CLIP_STD[ch])                     # (PATCH_DIM,)
    c = -(CLIP_MEAN[ch] / CLIP_STD[ch])                  # (PATCH_DIM,)
    w1_f = a[:, None] * w1                               # (PATCH_DIM, HIDDEN)
    b1_f = b1 + c[None, :] @ w1                          # (1, HIDDEN)
    return w1_f, b1_f


def make_pool_matrices():
    """Constant mean-pooling matrices (computed offline, passed to the kernel)."""
    rows = jnp.arange(8)[:, None]
    cols_c = jnp.arange(N_CLIP_ROWS)[None, :]
    pc = jnp.where(cols_c // N_PATCH == rows, 1.0 / N_PATCH, 0.0)        # (8, 32)
    pv = jnp.broadcast_to(jnp.where(rows == 2, 1.0 / N_VIDEO_ROWS, 0.0),
                          (8, N_VIDEO_ROWS))                              # (8, 64)
    return pc.astype(jnp.float32), pv.astype(jnp.float32)


def init_params(key):
    k = jax.random.split(key, 6)
    scale = 0.02

    def enc(kw1, kb1, kw2):
        return (jax.random.normal(kw1, (PATCH_DIM, HIDDEN), jnp.float32) * scale,
                jax.random.normal(kb1, (1, HIDDEN), jnp.float32) * scale,
                jax.random.normal(kw2, (HIDDEN, EMBED), jnp.float32) * scale)

    w1c, b1c, w2c = enc(k[0], k[1], k[2])   # synthetic openai/clip-vit-base-patch32
    w1x, b1x, w2x = enc(k[3], k[4], k[5])   # synthetic microsoft/xclip-base-patch32
    w1c_f, b1c_f = fold_norm_into_encoder(w1c, b1c)
    w1x_f, b1x_f = fold_norm_into_encoder(w1x, b1x)

    w1 = jnp.concatenate([w1c_f, w1x_f], axis=1).astype(jnp.bfloat16)   # (192, 256)
    b1 = jnp.concatenate([b1c_f, b1x_f], axis=1)                        # (1, 256) f32
    w2 = jnp.concatenate([w2c, w2x], axis=1).astype(jnp.bfloat16)       # (128, 256)
    pc, pv = make_pool_matrices()
    return {"w1": w1, "b1": b1, "w2": w2, "pc": pc, "pv": pv}


@jax.jit
def _forward_core(image_0, image_1, images, params):
    """Jitted: concatenate + patchify + fused Pallas call + output slicing."""
    stacked = jnp.concatenate([image_0, image_1] + list(images), axis=0)  # (6,C,H,W)
    patches = patchify_batch(stacked)                                     # (96, 192)
    out = fused_forward_call(patches, params["w1"], params["b1"], params["w2"],
                             params["pc"], params["pv"])
    return out[0, 0].reshape(1), out[1, 0].reshape(1)


def clip_similarity_forward(image_0, image_1, images, text, params):
    del text  # TODO(synk): X-CLIP text tokenizer/encoder not used for video_embeds

    sim_video_0, sim_video_1 = _forward_core(image_0, image_1, images, params)

    # TODO(synk): OpenCV Lucas-Kanade / Farneback optical flow has no Pallas equivalent.
    optical_flow = jnp.zeros((len(images) - 1,), jnp.float32)
    optical_flow_img = jnp.zeros((len(images),), jnp.float32)

    return sim_video_0, sim_video_1, optical_flow, optical_flow_img


# ----------------------------------- main -------------------------------------
if __name__ == "__main__":
    key = jax.random.PRNGKey(0)
    keys = jax.random.split(key, 3 + N_FRAMES)
    kp, k0, k1 = keys[0], keys[1], keys[2]
    kf = keys[3:]

    params = init_params(kp)

    image_0 = jax.random.uniform(k0, (1, IMG_C, IMG_H, IMG_W), jnp.float32, -1.0, 1.0)
    image_1 = jax.random.uniform(k1, (1, IMG_C, IMG_H, IMG_W), jnp.float32, -1.0, 1.0)
    images = [
        jax.random.uniform(kf[i], (1, IMG_C, IMG_H, IMG_W), jnp.float32, -1.0, 1.0)
        for i in range(N_FRAMES)
    ]
    text = ["a synthetic prompt describing the edit"]

    out = clip_similarity_forward(image_0, image_1, images, text, params)
    out = jax.block_until_ready(out)

    sim0, sim1, flow, flow_img = out
    assert sim0.shape == (1,) and sim1.shape == (1,)
    assert flow.shape == (N_FRAMES - 1,) and flow_img.shape == (N_FRAMES,)
    assert bool(jnp.isfinite(sim0).all()) and bool(jnp.isfinite(sim1).all())
    assert bool((jnp.abs(sim0) <= 1.0 + 1e-5).all()) and bool((jnp.abs(sim1) <= 1.0 + 1e-5).all())
    print("KERNEL_OK")
</pallas_src>

<mosaic_0001>
module attributes {stable_mosaic.version = 11 : i64} {
  func.func @fused_clip_kernel(%arg0: memref<96x192xf32, #tpu.memory_space<vmem>>, %arg1: memref<192x256xbf16, #tpu.memory_space<vmem>>, %arg2: memref<1x256xf32, #tpu.memory_space<vmem>>, %arg3: memref<128x256xbf16, #tpu.memory_space<vmem>>, %arg4: memref<8x32xf32, #tpu.memory_space<vmem>>, %arg5: memref<8x64xf32, #tpu.memory_space<vmem>>, %arg6: memref<8x128xf32, #tpu.memory_space<vmem>>) attributes {dimension_semantics = [], scalar_prefetch = 0 : i64, scratch_operands = 0 : i64, tpu.core_type = #tpu.core_type<tc>} {
    %c0 = arith.constant 0 : index
    %c0_0 = arith.constant 0 : index
    %0 = vector.load %arg0[%c0, %c0_0] : memref<96x192xf32, #tpu.memory_space<vmem>>, vector<96x192xf32>
    %cst = arith.constant 1.000000e+00 : f32
    %1 = vector.broadcast %cst : f32 to vector<96x192xf32>
    %2 = arith.addf %0, %1 : vector<96x192xf32>
    %cst_1 = arith.constant 1.275000e+02 : f32
    %3 = vector.broadcast %cst_1 : f32 to vector<96x192xf32>
    %4 = arith.mulf %2, %3 : vector<96x192xf32>
    %cst_2 = arith.constant 0.000000e+00 : f32
    %cst_3 = arith.constant 2.550000e+02 : f32
    %5 = vector.broadcast %cst_2 : f32 to vector<96x192xf32>
    %6 = arith.maximumf %5, %4 : vector<96x192xf32>
    %7 = vector.broadcast %cst_3 : f32 to vector<96x192xf32>
    %8 = arith.minimumf %7, %6 : vector<96x192xf32>
    %9 = math.floor %8 : vector<96x192xf32>
    %10 = arith.truncf %9 : vector<96x192xf32> to vector<96x192xbf16>
    %c0_4 = arith.constant 0 : index
    %c0_5 = arith.constant 0 : index
    %11 = vector.load %arg1[%c0_4, %c0_5] : memref<192x256xbf16, #tpu.memory_space<vmem>>, vector<192x256xbf16>
    %cst_6 = arith.constant dense<0.000000e+00> : vector<96x256xf32>
    %12 = tpu.matmul %10, %11, %cst_6 {dimension_numbers = #tpu.dot_dimension_numbers<[1], [0], [0], [1], [0, 0, 1, 1], [], []>} : vector<96x192xbf16>, vector<192x256xbf16>, vector<96x256xf32> -> vector<96x256xf32>
    %c0_7 = arith.constant 0 : index
    %c0_8 = arith.constant 0 : index
    %13 = vector.load %arg2[%c0_7, %c0_8] : memref<1x256xf32, #tpu.memory_space<vmem>>, vector<1x256xf32>
    %14 = vector.broadcast %13 : vector<1x256xf32> to vector<96x256xf32>
    %15 = arith.addf %12, %14 : vector<96x256xf32>
    %16 = vector.extract_strided_slice %15 {offsets = [0, 0], sizes = [32, 128], strides = [1, 1]} : vector<96x256xf32> to vector<32x128xf32>
    %17 = arith.mulf %16, %16 : vector<32x128xf32>
    %18 = arith.mulf %16, %17 : vector<32x128xf32>
    %cst_9 = arith.constant 4.471500e-02 : f32
    %19 = vector.broadcast %cst_9 : f32 to vector<32x128xf32>
    %20 = arith.mulf %19, %18 : vector<32x128xf32>
    %21 = arith.addf %16, %20 : vector<32x128xf32>
    %cst_10 = arith.constant 0.797884583 : f32
    %22 = vector.broadcast %cst_10 : f32 to vector<32x128xf32>
    %23 = arith.mulf %22, %21 : vector<32x128xf32>
    %24 = math.tanh %23 : vector<32x128xf32>
    %cst_11 = arith.constant 1.000000e+00 : f32
    %25 = vector.broadcast %cst_11 : f32 to vector<32x128xf32>
    %26 = arith.addf %25, %24 : vector<32x128xf32>
    %cst_12 = arith.constant 5.000000e-01 : f32
    %27 = vector.broadcast %cst_12 : f32 to vector<32x128xf32>
    %28 = arith.mulf %27, %26 : vector<32x128xf32>
    %29 = arith.mulf %16, %28 : vector<32x128xf32>
    %30 = vector.extract_strided_slice %15 {offsets = [32, 128], sizes = [64, 128], strides = [1, 1]} : vector<96x256xf32> to vector<64x128xf32>
    %31 = arith.mulf %30, %30 : vector<64x128xf32>
    %32 = arith.mulf %30, %31 : vector<64x128xf32>
    %cst_13 = arith.constant 4.471500e-02 : f32
    %33 = vector.broadcast %cst_13 : f32 to vector<64x128xf32>
    %34 = arith.mulf %33, %32 : vector<64x128xf32>
    %35 = arith.addf %30, %34 : vector<64x128xf32>
    %cst_14 = arith.constant 0.797884583 : f32
    %36 = vector.broadcast %cst_14 : f32 to vector<64x128xf32>
    %37 = arith.mulf %36, %35 : vector<64x128xf32>
    %38 = math.tanh %37 : vector<64x128xf32>
    %cst_15 = arith.constant 1.000000e+00 : f32
    %39 = vector.broadcast %cst_15 : f32 to vector<64x128xf32>
    %40 = arith.addf %39, %38 : vector<64x128xf32>
    %cst_16 = arith.constant 5.000000e-01 : f32
    %41 = vector.broadcast %cst_16 : f32 to vector<64x128xf32>
    %42 = arith.mulf %41, %40 : vector<64x128xf32>
    %43 = arith.mulf %30, %42 : vector<64x128xf32>
    %c0_17 = arith.constant 0 : index
    %c0_18 = arith.constant 0 : index
    %44 = vector.load %arg4[%c0_17, %c0_18] : memref<8x32xf32, #tpu.memory_space<vmem>>, vector<8x32xf32>
    %cst_19 = arith.constant dense<0.000000e+00> : vector<8x128xf32>
    %45 = tpu.matmul %44, %29, %cst_19 {dimension_numbers = #tpu.dot_dimension_numbers<[1], [0], [0], [1], [0, 0, 1, 1], [], []>} : vector<8x32xf32>, vector<32x128xf32>, vector<8x128xf32> -> vector<8x128xf32>
    %c0_20 = arith.constant 0 : index
    %c0_21 = arith.constant 0 : index
    %46 = vector.load %arg5[%c0_20, %c0_21] : memref<8x64xf32, #tpu.memory_space<vmem>>, vector<8x64xf32>
    %cst_22 = arith.constant dense<0.000000e+00> : vector<8x128xf32>
    %47 = tpu.matmul %46, %43, %cst_22 {dimension_numbers = #tpu.dot_dimension_numbers<[1], [0], [0], [1], [0, 0, 1, 1], [], []>} : vector<8x64xf32>, vector<64x128xf32>, vector<8x128xf32> -> vector<8x128xf32>
    %48 = arith.addf %45, %47 : vector<8x128xf32>
    %49 = arith.truncf %48 : vector<8x128xf32> to vector<8x128xbf16>
    %c0_23 = arith.constant 0 : index
    %c0_24 = arith.constant 0 : index
    %50 = vector.load %arg3[%c0_23, %c0_24] : memref<128x256xbf16, #tpu.memory_space<vmem>>, vector<128x256xbf16>
    %cst_25 = arith.constant dense<0.000000e+00> : vector<8x256xf32>
    %51 = tpu.matmul %49, %50, %cst_25 {dimension_numbers = #tpu.dot_dimension_numbers<[1], [0], [0], [1], [0, 0, 1, 1], [], []>} : vector<8x128xbf16>, vector<128x256xbf16>, vector<8x256xf32> -> vector<8x256xf32>
    %52 = vector.extract_strided_slice %51 {offsets = [0, 0], sizes = [8, 128], strides = [1, 1]} : vector<8x256xf32> to vector<8x128xf32>
    %53 = vector.extract_strided_slice %51 {offsets = [2, 128], sizes = [1, 128], strides = [1, 1]} : vector<8x256xf32> to vector<1x128xf32>
    %54 = vector.broadcast %53 : vector<1x128xf32> to vector<8x128xf32>
    %55 = arith.mulf %52, %54 : vector<8x128xf32>
    %cst_26 = arith.constant dense<0.000000e+00> : vector<8xf32>
    %56 = vector.multi_reduction <add>, %55, %cst_26 [1] : vector<8x128xf32> to vector<8xf32>
    %57 = vector.shape_cast %56 : vector<8xf32> to vector<8x1xf32>
    %58 = arith.mulf %52, %52 : vector<8x128xf32>
    %cst_27 = arith.constant dense<0.000000e+00> : vector<8xf32>
    %59 = vector.multi_reduction <add>, %58, %cst_27 [1] : vector<8x128xf32> to vector<8xf32>
    %60 = vector.shape_cast %59 : vector<8xf32> to vector<8x1xf32>
    %61 = arith.mulf %53, %53 : vector<1x128xf32>
    %cst_28 = arith.constant dense<0.000000e+00> : vector<1xf32>
    %62 = vector.multi_reduction <add>, %61, %cst_28 [1] : vector<1x128xf32> to vector<1xf32>
    %63 = vector.shape_cast %62 : vector<1xf32> to vector<1x1xf32>
    %cst_29 = arith.constant 1.000000e-16 : f32
    %64 = vector.broadcast %cst_29 : f32 to vector<8x1xf32>
    %65 = arith.maximumf %60, %64 : vector<8x1xf32>
    %66 = math.rsqrt %65 : vector<8x1xf32>
    %67 = arith.mulf %57, %66 : vector<8x1xf32>
    %cst_30 = arith.constant 1.000000e-16 : f32
    %68 = vector.broadcast %cst_30 : f32 to vector<1x1xf32>
    %69 = arith.maximumf %63, %68 : vector<1x1xf32>
    %70 = math.rsqrt %69 : vector<1x1xf32>
    %71 = vector.broadcast %70 : vector<1x1xf32> to vector<8x1xf32>
    %72 = arith.mulf %67, %71 : vector<8x1xf32>
    %73 = vector.shape_cast %72 : vector<8x1xf32> to vector<8x1xf32>
    %74 = vector.broadcast %73 : vector<8x1xf32> to vector<8x128xf32>
    %c0_31 = arith.constant 0 : index
    %c0_32 = arith.constant 0 : index
    %75 = vector.load %arg6[%c0_31, %c0_32] : memref<8x128xf32, #tpu.memory_space<vmem>>, vector<8x128xf32>
    tpu.vector_store %arg6[%c0_31, %c0_32], %74 {strides = array<i32>} : memref<8x128xf32, #tpu.memory_space<vmem>>, vector<8x128xf32>,
    return
  }
}

</mosaic_0001>

<bundles_post_ra>
// kernel: _forward_core.1
= control target key start
LH: loop header
LB: loop body
LE: loop exit
PB: predicated region body
PF: predicated region fallthrough
CT: control target
= control target key end

     0   :  { %vm336_vm0 = vcmask 523264   ;;  %vm1045_vm1 = vmmov 0   ;;  %vm619_vm2 = vcmask 261120   ;;  %vm842_vm3 = vcmask 1042434   ;;  %s1401_s1 = inlined_call_operand.vmem [shape: bf16[192,256], index: 1, kind: input, shape index: {}]   ;;  %s1402_s0 = inlined_call_operand.vmem [shape: f32[96,192], index: 0, kind: input, shape index: {}]   ;;  %s1403_s3 = inlined_call_operand.vmem [shape: bf16[128,256], index: 3, kind: input, shape index: {}]   ;;  %s1404_s2 = inlined_call_operand.vmem [shape: f32[1,256], index: 2, kind: input, shape index: {}]   ;;  %s1405_s5 = inlined_call_operand.vmem [shape: f32[8,64], index: 5, kind: input, shape index: {}]   ;;  %s1406_s4 = inlined_call_operand.vmem [shape: f32[8,32], index: 4, kind: input, shape index: {}]   ;;  %s1407_s6 = inlined_call_operand.vmem [shape: f32[8,128], index: 6, kind: output, shape index: {}]  }
   0x1   :  { %v956_v0 = vld [vmem:[%s1401_s1 + $0x74] ss:$8 sps:$4 sm:$0xff]   ;;  %v958_v1 = vld [vmem:[%s1401_s1 + $0x70] ss:$8 sps:$4 sm:$0xff]   ;;  %v959_v2 = vld [vmem:[%s1401_s1 + $0x64] ss:$8 sps:$4 sm:$0xff]  }
   0x2   :  { %355 = vmatprep.subr.bf16.mxu0 %v956_v0  ;;  %v961_v3 = vld [vmem:[%s1401_s1 + $0x60] ss:$8 sps:$4 sm:$0xff]   ;;  %v962_v4 = vld [vmem:[%s1401_s1 + $0x54] ss:$8 sps:$4 sm:$0xff]   ;;  %v964_v5 = vld [vmem:[%s1401_s1 + $0x50] ss:$8 sps:$4 sm:$0xff]  }
   0x3   :  { %356 = vmatpush1.bf16.msra.mxu0 %v958_v1  ;;  %v965_v6 = vld [vmem:[%s1401_s1 + $0x44] ss:$8 sps:$4 sm:$0xff]   ;;  %v967_v7 = vld [vmem:[%s1401_s1 + $0x40] ss:$8 sps:$4 sm:$0xff]   ;;  %v968_v8 = vld [vmem:[%s1401_s1 + $0x34] ss:$8 sps:$4 sm:$0xff]  }
   0x4   :  { %357 = vmatprep.subr.bf16.mxu0 %v959_v2  ;;  %v970_v9 = vld [vmem:[%s1401_s1 + $0x30] ss:$8 sps:$4 sm:$0xff]   ;;  %v971_v10 = vld [vmem:[%s1401_s1 + $0x24] ss:$8 sps:$4 sm:$0xff]   ;;  %v973_v15 = vld [vmem:[%s1401_s1 + $0x20] ss:$8 sps:$4 sm:$0xff]  }
   0x5   :  { %v25_v11 = vld [vmem:[%s1402_s0 + $0x8] sm:$0xff]  ;;  %v27_v12 = vld [vmem:[%s1402_s0 + $0x18] sm:$0xff]  ;;  %v24_v24 = vld [vmem:[%s1402_s0] sm:$0xff] }
   0x6   :  { %v49_v13 = vadd.f32 1.0, %v25_v11  ;;  %v51_v14 = vadd.f32 1.0, %v27_v12  ;;  %v974_v18 = vld [vmem:[%s1401_s1 + $0x14] ss:$8 sps:$4 sm:$0xff]   ;;  %v976_v21 = vld [vmem:[%s1401_s1 + $0x10] ss:$8 sps:$4 sm:$0xff]  }
   0x7   :  { %358 = vmatpush1.bf16.msra.mxu0 %v961_v3  ;;  %v26_v25 = vld [vmem:[%s1402_s0 + $0x10] sm:$0xff]  ;;  %v977_v26 = vld [vmem:[%s1401_s1 + $0x4] ss:$8 sps:$4 sm:$0xff]   ;;  %v31_v28 = vld [vmem:[%s1402_s0 + $0x38] sm:$0xff]  ;;  %v48_v31 = vadd.f32 1.0, %v24_v24 }
   0x8   :  { %359 = vmatprep.subr.bf16.mxu0 %v962_v4  ;;  %v73_v16 = vmul.f32 127.5, %v49_v13  ;;  %v75_v17 = vmul.f32 127.5, %v51_v14  ;;  %v29_v27 = vld [vmem:[%s1402_s0 + $0x28] sm:$0xff]  ;;  %v50_v32 = vadd.f32 1.0, %v26_v25  ;;  %v55_v36 = vadd.f32 1.0, %v31_v28  ;;  %v28_v40 = vld [vmem:[%s1402_s0 + $0x20] sm:$0xff] }
   0x9   :  { %v979_v33 = vld [vmem:[%s1401_s1] ss:$8 sps:$4 sm:$0xff]   ;;  %v53_v35 = vadd.f32 1.0, %v29_v27  ;;  %v980_v37 = vld [vmem:[%s1401_s1 + $0xb4] ss:$8 sps:$4 sm:$0xff]   ;;  %v72_v38 = vmul.f32 127.5, %v48_v31 }
   0xa   :  { %v97_v19 = vmax.f32 %v73_v16, 0.0  ;;  %v99_v20 = vmax.f32 %v75_v17, 0.0  ;;  %v74_v39 = vmul.f32 127.5, %v50_v32  ;;  %v30_v41 = vld [vmem:[%s1402_s0 + $0x30] sm:$0xff]  ;;  %v79_v44 = vmul.f32 127.5, %v55_v36  ;;  %v33_v46 = vld [vmem:[%s1402_s0 + $0x48] sm:$0xff] }
   0xb   :  { %360 = vmatpush1.bf16.msra.mxu0 %v964_v5  ;;  %v982_v42 = vld [vmem:[%s1401_s1 + $0xb0] ss:$8 sps:$4 sm:$0xff]   ;;  %v77_v43 = vmul.f32 127.5, %v53_v35  ;;  %v983_v45 = vld [vmem:[%s1401_s1 + $0xa4] ss:$8 sps:$4 sm:$0xff]   ;;  %v52_v48 = vadd.f32 1.0, %v28_v40 }
   0xc   :  { %361 = vmatprep.subr.bf16.mxu0 %v965_v6  ;;  %v121_v22 = vmin.f32 %v97_v19, 255.0  ;;  %v123_v23 = vmin.f32 %v99_v20, 255.0  ;;  %v35_v47 = vld [vmem:[%s1402_s0 + $0x58] sm:$0xff]  ;;  %v54_v49 = vadd.f32 1.0, %v30_v41  ;;  %v96_v50 = vmax.f32 %v72_v38, 0.0  ;;  %v32_v63 = vld [vmem:[%s1402_s0 + $0x40] sm:$0xff] }
   0xd   :  { %v98_v51 = vmax.f32 %v74_v39, 0.0  ;;  %v985_v52 = vld [vmem:[%s1401_s1 + $0xa0] ss:$8 sps:$4 sm:$0xff]   ;;  %v101_v53 = vmax.f32 %v77_v43, 0.0  ;;  %v103_v54 = vmax.f32 %v79_v44, 0.0  ;;  %v57_v55 = vadd.f32 1.0, %v33_v46 }
   0xe   :  { %v145_v29 = vfloor.f32 %v121_v22  ;;  %v147_v30 = vfloor.f32 %v123_v23  ;;  %v59_v56 = vadd.f32 1.0, %v35_v47  ;;  %v986_v57 = vld [vmem:[%s1401_s1 + $0x94] ss:$8 sps:$4 sm:$0xff]   ;;  %v76_v58 = vmul.f32 127.5, %v52_v48  ;;  %v988_v60 = vld [vmem:[%s1401_s1 + $0x90] ss:$8 sps:$4 sm:$0xff]  }
   0xf   :  { %362 = vmatpush1.bf16.msra.mxu0 %v967_v7  ;;  %v78_v59 = vmul.f32 127.5, %v54_v49  ;;  %v120_v61 = vmin.f32 %v96_v50, 255.0  ;;  %v122_v62 = vmin.f32 %v98_v51, 255.0  ;;  %v34_v0 = vld [vmem:[%s1402_s0 + $0x50] sm:$0xff]  ;;  %v125_v1 = vmin.f32 %v101_v53, 255.0  ;;  %v37_v5 = vld [vmem:[%s1402_s0 + $0x68] sm:$0xff] }
  0x10   :  { %363 = vmatprep.subr.bf16.mxu0 %v968_v8  ;;  %v169_v34 = vpack.c.bf16 %v147_v30, %v145_v29  ;;  %v127_v2 = vmin.f32 %v103_v54, 255.0  ;;  %v81_v3 = vmul.f32 127.5, %v57_v55  ;;  %v83_v4 = vmul.f32 127.5, %v59_v56  ;;  %v39_v6 = vld [vmem:[%s1402_s0 + $0x78] sm:$0xff]  ;;  %v989_v7 = vld [vmem:[%s1401_s1 + $0x84] ss:$8 sps:$4 sm:$0xff]  }
  0x11   :  { %v100_v8 = vmax.f32 %v76_v58, 0.0  ;;  %v58_v11 = vadd.f32 1.0, %v34_v0  ;;  %v144_v12 = vfloor.f32 %v120_v61  ;;  %v146_v13 = vfloor.f32 %v122_v62  ;;  %v991_v16 = vld [vmem:[%s1401_s1 + $0x80] ss:$8 sps:$4 sm:$0xff]   ;;  %v38_v29 = vld [vmem:[%s1402_s0 + $0x70] sm:$0xff] }
  0x12   :  { %885 = vmatprep.mubr.msk.bf16.mxu0 %vm336_vm0, %v169_v34  ;;  %v61_v14 = vadd.f32 1.0, %v37_v5  ;;  %v149_v17 = vfloor.f32 %v125_v1  ;;  %v105_v19 = vmax.f32 %v81_v3, 0.0  ;;  %v107_v20 = vmax.f32 %v83_v4, 0.0  ;;  %v36_v28 = vld [vmem:[%s1402_s0 + $0x60] sm:$0xff]  ;;  %v43_v34 = vld [vmem:[%s1402_s0 + $0x98] sm:$0xff]  ;;  %v42_v58 = vld [vmem:[%s1402_s0 + $0x90] sm:$0xff] }
  0x13   :  { %364 = vmatpush1.bf16.msra.mxu0 %v970_v9  ;;  %v102_v9 = vmax.f32 %v78_v59, 0.0  ;;  %v82_v23 = vmul.f32 127.5, %v58_v11  ;;  %v168_v24 = vpack.c.bf16 %v146_v13, %v144_v12  ;;  %v62_v38 = vadd.f32 1.0, %v38_v29  ;;  %v45_v59 = vld [vmem:[%s1402_s0 + $0xa8] sm:$0xff] }
  0x14   :  { %365 = vmatprep.subr.bf16.mxu0 %v971_v10  ;;  %v56_v10 = vadd.f32 1.0, %v32_v63  ;;  %v129_v31 = vmin.f32 %v105_v19, 255.0  ;;  %v131_v32 = vmin.f32 %v107_v20, 255.0  ;;  %v67_v46 = vadd.f32 1.0, %v43_v34  ;;  %v44_v19 = vld [vmem:[%s1402_s0 + $0xa0] sm:$0xff]  ;;  %v46_v20 = vld [vmem:[%s1402_s0 + $0xb0] sm:$0xff] }
  0x15   :  { %v126_v25 = vmin.f32 %v102_v9, 255.0  ;;  %v106_v36 = vmax.f32 %v82_v23, 0.0  ;;  %v86_v50 = vmul.f32 127.5, %v62_v38  ;;  %v66_v4 = vadd.f32 1.0, %v42_v58 }
  0x16   :  { %v80_v22 = vmul.f32 127.5, %v56_v10  ;;  %v153_v43 = vfloor.f32 %v129_v31  ;;  %v155_v44 = vfloor.f32 %v131_v32  ;;  %v91_v56 = vmul.f32 127.5, %v67_v46 }
  0x17   :  { %366 = vmatpush1.bf16.msra.mxu0 %v973_v15  ;;  %v63_v15 = vadd.f32 1.0, %v39_v6  ;;  %v150_v40 = vfloor.f32 %v126_v25  ;;  %v130_v48 = vmin.f32 %v106_v36, 255.0  ;;  %v110_v0 = vmax.f32 %v86_v50, 0.0 }
  0x18   :  { %367 = vmatprep.subr.bf16.mxu0 %v974_v18  ;;  %v151_v18 = vfloor.f32 %v127_v2  ;;  %v104_v35 = vmax.f32 %v80_v22, 0.0  ;;  %v173_v54 = vpack.c.bf16 %v155_v44, %v153_v43  ;;  %v115_v6 = vmax.f32 %v91_v56, 0.0 }
  0x19   :  { %v87_v27 = vmul.f32 127.5, %v63_v15  ;;  %v154_v62 = vfloor.f32 %v130_v48  ;;  %v134_v10 = vmin.f32 %v110_v0, 255.0  ;;  %v68_v25 = vadd.f32 1.0, %v44_v19 }
  0x1a   :  { %v171_v30 = vpack.c.bf16 %v151_v18, %v149_v17  ;;  %v128_v47 = vmin.f32 %v104_v35, 255.0 }
  0x1b   :  { %368 = vmatpush1.bf16.msra.mxu0 %v976_v21  ;;  %v124_v21 = vmin.f32 %v100_v8, 255.0  ;;  %v158_v22 = vfloor.f32 %v134_v10  ;;  %v92_v34 = vmul.f32 127.5, %v68_v25 }
  0x1c   :  { %369 = vmatprep.subr.bf16.mxu0 %v977_v26  ;;  %v85_v26 = vmul.f32 127.5, %v61_v14  ;;  %v152_v61 = vfloor.f32 %v128_v47  ;;  %v90_v14 = vmul.f32 127.5, %v66_v4 }
  0x1d   :  { %v148_v39 = vfloor.f32 %v124_v21 }
  0x1e   :  { %v109_v41 = vmax.f32 %v85_v26, 0.0  ;;  %v172_v11 = vpack.c.bf16 %v154_v62, %v152_v61  ;;  %v70_v26 = vadd.f32 1.0, %v46_v20 }
  0x1f   :  { %370 = vmatpush1.bf16.msra.mxu0 %v979_v33  ;;  %v41_v33 = vld [vmem:[%s1402_s0 + $0x88] sm:$0xff]  ;;  %v170_v51 = vpack.c.bf16 %v150_v40, %v148_v39 }
  0x20   :  { %379 = vmatprep.subr.bf16.mxu0 %v980_v37  ;;  %v60_v37 = vadd.f32 1.0, %v36_v28  ;;  %v94_v35 = vmul.f32 127.5, %v70_v26 }
  0x22   :  { %v84_v49 = vmul.f32 127.5, %v60_v37 }
  0x23   :  { %380 = vmatpush2.bf16.msra.mxu0 %v982_v42  ;;  %v111_v42 = vmax.f32 %v87_v27, 0.0 }
  0x24   :  { %381 = vmatprep.subr.bf16.mxu0 %v983_v45  ;;  %v65_v45 = vadd.f32 1.0, %v41_v33  ;;  %v108_v63 = vmax.f32 %v84_v49, 0.0 }
  0x25   :  { %v135_v53 = vmin.f32 %v111_v42, 255.0  ;;  %v118_v42 = vmax.f32 %v94_v35, 0.0 }
  0x26   :  { %v89_v55 = vmul.f32 127.5, %v65_v45  ;;  %v132_v9 = vmin.f32 %v108_v63, 255.0 }
  0x27   :  { %382 = vmatpush2.bf16.msra.mxu0 %v985_v52  ;;  %v133_v52 = vmin.f32 %v109_v41, 255.0  ;;  %v159_v2 = vfloor.f32 %v135_v53  ;;  %v116_v41 = vmax.f32 %v92_v34, 0.0  ;;  %v142_v47 = vmin.f32 %v118_v42, 255.0 }
  0x28   :  { %383 = vmatprep.subr.bf16.mxu0 %v986_v57  ;;  %v40_v57 = vld [vmem:[%s1402_s0 + $0x80] sm:$0xff]  ;;  %v113_v5 = vmax.f32 %v89_v55, 0.0  ;;  %v156_v21 = vfloor.f32 %v132_v9 }
  0x29   :  { %v157_v1 = vfloor.f32 %v133_v52  ;;  %v64_v3 = vadd.f32 1.0, %v40_v57  ;;  %v140_v46 = vmin.f32 %v116_v41, 255.0  ;;  %v166_v50 = vfloor.f32 %v142_v47 }
  0x2a   :  { %v137_v15 = vmin.f32 %v113_v5, 255.0  ;;  %v174_v31 = vpack.c.bf16 %v158_v22, %v156_v21  ;;  %v1044_v52 = vmov 0.0  }
  0x2b   :  { %384 = vmatpush2.bf16.msra.mxu0 %v988_v60  ;;  %v47_v60 = vld [vmem:[%s1402_s0 + $0xb8] sm:$0xff]  ;;  %v175_v12 = vpack.c.bf16 %v159_v2, %v157_v1  ;;  %v88_v13 = vmul.f32 127.5, %v64_v3  ;;  %v164_v49 = vfloor.f32 %v140_v46  ;;  %923 = vmatprep.subr.mxu1 %v1044_v52  ;;  %v206_v1 = vlaneseq }
  0x2c   :  { %385 = vmatprep.subr.bf16.mxu0 %v989_v7  ;;  %v69_v7 = vadd.f32 1.0, %v45_v59  ;;  %v71_v8 = vadd.f32 1.0, %v47_v60  ;;  %v161_v27 = vfloor.f32 %v137_v15  ;;  %939 = vmatprep.mubr.msk.f32.mxu1 %vm1045_vm1, %v1044_v52 }
  0x2d   :  { %v112_v23 = vmax.f32 %v88_v13, 0.0  ;;  %v1237_v4 = vshrl.u32 %v206_v1, 7 }
  0x2e   :  { %v93_v17 = vmul.f32 127.5, %v69_v7  ;;  %v95_v18 = vmul.f32 127.5, %v71_v8  ;;  %v204_v8 = vld [vmem:[%s1404_s2] sm:$0x3] }
  0x2f   :  { %386 = vmatpush2.bf16.msra.mxu0 %v991_v16  ;;  %v139_v16 = vmin.f32 %v115_v6, 255.0  ;;  %v136_v32 = vmin.f32 %v112_v23, 255.0  ;;  %v212_v6 = vsub.s32 1, %v1237_v4  ;;  %v208_v15 = vsub.s32 0, %v1237_v4 }
  0x30   :  { %v117_v29 = vmax.f32 %v93_v17, 0.0 }
  0x31   :  { %v163_v28 = vfloor.f32 %v139_v16  ;;  %v160_v39 = vfloor.f32 %v136_v32  ;;  %v213_v10 = vrot.slane %v204_v8, %v212_v6 }
  0x32   :  { %388 = vmatmul.mubr.bf16.vlgmr.msra.gmra.mxu0 %v168_v24  ;;  %v114_v24 = vmax.f32 %v90_v14, 0.0  ;;  %v141_v37 = vmin.f32 %v117_v29, 255.0 }
  0x33   :  { %886 = vmatprep.mubr.msk.bf16.mxu0 %vm336_vm0, %v171_v30  ;;  %v119_v30 = vmax.f32 %v95_v18, 0.0  ;;  %v177_v36 = vpack.c.bf16 %v163_v28, %v161_v27 }
  0x34   :  { %v138_v33 = vmin.f32 %v114_v24, 255.0  ;;  %v165_v43 = vfloor.f32 %v141_v37  ;;  %v209_v24 = vrot.slane %v204_v8, %v208_v15 }
  0x35   :  { %v143_v38 = vmin.f32 %v119_v30, 255.0 }
  0x36   :  { %v162_v40 = vfloor.f32 %v138_v33 }
  0x37   :  { %v167_v44 = vfloor.f32 %v143_v38 }
  0x38   :  { %v176_v45 = vpack.c.bf16 %v162_v40, %v160_v39 }
  0x39   :  { %v179_v48 = vpack.c.bf16 %v167_v44, %v165_v43 }
  0x3a   :  { %396 = vmatmul.mubr.bf16.gmra.mxu0 %v170_v51  ;;  %v178_v51 = vpack.c.bf16 %v166_v50, %v164_v49 }
  0x3b   :  { %887 = vmatprep.mubr.msk.bf16.mxu0 %vm336_vm0, %v173_v54 }
  0x42   :  { %404 = vmatmul.mubr.bf16.gmra.mxu0 %v172_v11 }
  0x43   :  { %888 = vmatprep.mubr.msk.bf16.mxu0 %vm336_vm0, %v175_v12 }
  0x4a   :  { %412 = vmatmul.mubr.bf16.gmra.mxu0 %v174_v31 }
  0x4b   :  { %889 = vmatprep.mubr.msk.bf16.mxu0 %vm336_vm0, %v177_v36 }
  0x52   :  { %420 = vmatmul.mubr.bf16.gmra.mxu0 %v176_v45 }
  0x53   :  { %890 = vmatprep.mubr.msk.bf16.mxu0 %vm336_vm0, %v179_v48 }
  0x5a   :  { %428 = vmatmul.mubr.bf16.gmra.mxu0 %v178_v51 }
  0xf2   :  { %v1235_v53 = vpop.f32.mrf.mxu0 }
  0xf3   :  { %v1292_v51 = vadd.f32 %v1235_v53, %v209_v24 }
  0xf4   :  { %v391_v54 = vpop.f32.mrf.mxu0 }
  0xf6   :  { %v392_v55 = vpop.f32.mrf.mxu0 }
  0xf7   :  { %v1283_v44 = vadd.f32 %v392_v55, %v209_v24 }
  0xf8   :  { %v394_v56 = vpop.f32.mrf.mxu0 }
  0xfa   :  { %v397_v57 = vpop.f32.mrf.mxu0 }
  0xfb   :  { %v1275_v37 = vadd.f32 %v397_v57, %v209_v24 }
  0xfc   :  { %v399_v58 = vpop.f32.mrf.mxu0 }
  0xfd   :  { %v438_v54 = vmul.f32 %v1275_v37, %v1275_v37 }
  0xfe   :  { %v400_v59 = vpop.f32.mrf.mxu0 }
  0xff   :  { %v1268_v31 = vadd.f32 %v400_v59, %v209_v24 }
 0x100   :  { %v402_v60 = vpop.f32.mrf.mxu0 }
 0x101   :  { %v439_v45 = vmul.f32 %v1268_v31, %v1268_v31  ;;  %v437_v60 = vmul.f32 %v1283_v44, %v1283_v44 }
 0x102   :  { %v405_v61 = vpop.f32.mrf.mxu0 }
 0x103   :  { %v443_v61 = vmul.f32 %v439_v45, %v1268_v31 }
 0x104   :  { %v406_v62 = vpop.f32.mrf.mxu0 }
 0x105   :  { %v1261_v27 = vadd.f32 %v406_v62, %v213_v10 }
 0x106   :  { %v408_v63 = vpop.f32.mrf.mxu0 }
 0x107   :  { %v472_v40 = vmul.f32 %v1261_v27, %v1261_v27 }
 0x108   :  { %v409_v0 = vpop.f32.mrf.mxu0 }
 0x109   :  { %v1254_v20 = vadd.f32 %v409_v0, %v213_v10  ;;  %v480_v56 = vmul.f32 %v472_v40, %v1261_v27 }
 0x10a   :  { %v413_v2 = vpop.f32.mrf.mxu0 }
 0x10b   :  { %v473_v32 = vmul.f32 %v1254_v20, %v1254_v20  ;;  %v436_v2 = vmul.f32 %v1292_v51, %v1292_v51  ;;  %v488_v6 = vmul.f32 0.044715, %v480_v56 }
 0x10c   :  { %v414_v3 = vpop.f32.mrf.mxu0 }
 0x10d   :  { %v1250_v18 = vadd.f32 %v414_v3, %v213_v10  ;;  %v481_v46 = vmul.f32 %v473_v32, %v1254_v20  ;;  %v442_v3 = vmul.f32 %v438_v54, %v1275_v37 }
 0x10e   :  { %v416_v5 = vpop.f32.mrf.mxu0 }
 0x10f   :  { %v474_v28 = vmul.f32 %v1250_v18, %v1250_v18  ;;  %v489_v62 = vmul.f32 0.044715, %v481_v46 }
 0x110   :  { %v417_v7 = vpop.f32.mrf.mxu0 }
 0x111   :  { %v1245_v14 = vadd.f32 %v417_v7, %v213_v10  ;;  %v482_v41 = vmul.f32 %v474_v28, %v1250_v18 }
 0x112   :  { %v421_v9 = vpop.f32.mrf.mxu0 }
 0x113   :  { %v475_v22 = vmul.f32 %v1245_v14, %v1245_v14  ;;  %v490_v57 = vmul.f32 0.044715, %v482_v41  ;;  %v441_v9 = vmul.f32 %v437_v60, %v1283_v44 }
 0x114   :  { %v422_v11 = vpop.f32.mrf.mxu0 }
 0x115   :  { %v1243_v12 = vadd.f32 %v422_v11, %v213_v10  ;;  %v483_v34 = vmul.f32 %v475_v22, %v1245_v14  ;;  %v498_v7 = vadd.f32 %v490_v57, %v1250_v18  ;;  %v497_v11 = vadd.f32 %v489_v62, %v1254_v20 }
 0x116   :  { %v424_v13 = vpop.f32.mrf.mxu0 }
 0x117   :  { %v476_v16 = vmul.f32 %v1243_v12, %v1243_v12  ;;  %v491_v47 = vmul.f32 0.044715, %v483_v34  ;;  %v506_v22 = vmul.f32 0.7978846, %v498_v7 }
 0x118   :  { %v425_v17 = vpop.f32.mrf.mxu0 }
 0x119   :  { %v1252_v19 = vadd.f32 %v425_v17, %v213_v10  ;;  %v484_v25 = vmul.f32 %v476_v16, %v1243_v12  ;;  %v499_v53 = vadd.f32 %v491_v47, %v1245_v14  ;;  %v440_v16 = vmul.f32 %v436_v2, %v1292_v51 }
 0x11a   :  { %v429_v21 = vpop.f32.mrf.mxu0  ;;  %v446_v17 = vmul.f32 0.044715, %v442_v3 }
 0x11b   :  { %v477_v23 = vmul.f32 %v1252_v19, %v1252_v19  ;;  %v492_v38 = vmul.f32 0.044715, %v484_v25  ;;  %v507_v13 = vmul.f32 0.7978846, %v499_v53  ;;  %v496_v21 = vadd.f32 %v488_v6, %v1261_v27 }
 0x11c   :  { %v430_v26 = vpop.f32.mrf.mxu0  ;;  %v505_v25 = vmul.f32 0.7978846, %v497_v11  ;;  %v450_v28 = vadd.f32 %v446_v17, %v1275_v37  ;;  %v545_v17 = vld [vmem:[%s1405_s5] sm:$0xff] }
 0x11d   :  { %v485_v29 = vmul.f32 %v477_v23, %v1252_v19  ;;  %v1266_v30 = vadd.f32 %v430_v26, %v213_v10  ;;  %v500_v55 = vadd.f32 %v492_v38, %v1243_v12  ;;  %v445_v23 = vmul.f32 0.044715, %v441_v9 }
 0x11e   :  { %v432_v33 = vpop.f32.mrf.mxu0  ;;  %v444_v26 = vmul.f32 0.044715, %v440_v16 }
 0x11f   :  { %v493_v35 = vmul.f32 0.044715, %v485_v29  ;;  %v478_v36 = vmul.f32 %v1266_v30, %v1266_v30  ;;  %v508_v5 = vmul.f32 0.7978846, %v500_v55  ;;  %v504_v29 = vmul.f32 0.7978846, %v496_v21 }
 0x120   :  { %v433_v39 = vpop.f32.mrf.mxu0  ;;  %v449_v32 = vadd.f32 %v445_v23, %v1283_v44  ;;  %v448_v34 = vadd.f32 %v444_v26, %v1292_v51  ;;  %v992_v26 = vld [vmem:[%s1403_s3 + $0x70] ss:$8 sps:$4 sm:$0xff]  }
 0x121   :  { %v486_v42 = vmul.f32 %v478_v36, %v1266_v30  ;;  %v1281_v43 = vadd.f32 %v433_v39, %v213_v10  ;;  %v501_v48 = vadd.f32 %v493_v35, %v1252_v19  ;;  %v447_v10 = vmul.f32 0.044715, %v443_v61 }
 0x122   :  { %v454_v35 = vmul.f32 0.7978846, %v450_v28  ;;  %v453_v38 = vmul.f32 0.7978846, %v449_v32  ;;  %v452_v41 = vmul.f32 0.7978846, %v448_v34 }
 0x123   :  { %v494_v49 = vmul.f32 0.044715, %v486_v42  ;;  %v479_v50 = vmul.f32 %v1281_v43, %v1281_v43  ;;  %v509_v63 = vmul.f32 0.7978846, %v501_v48  ;;  %v451_v24 = vadd.f32 %v447_v10, %v1268_v31  ;;  %v1000_v28 = vld [vmem:[%s1403_s3 + $0x54] ss:$8 sps:$4 sm:$0xff]  }
 0x124   :  { %v1001_v32 = vld [vmem:[%s1403_s3 + $0x40] ss:$8 sps:$4 sm:$0xff]   ;;  %v1004_v34 = vld [vmem:[%s1403_s3 + $0x30] ss:$8 sps:$4 sm:$0xff]  }
 0x125   :  { %v502_v58 = vadd.f32 %v494_v49, %v1266_v30  ;;  %v487_v59 = vmul.f32 %v479_v50, %v1281_v43  ;;  %v455_v33 = vmul.f32 0.7978846, %v451_v24 }
 0x127   :  { %v510_v0 = vmul.f32 0.7978846, %v502_v58  ;;  %v495_v1 = vmul.f32 0.044715, %v487_v59 }
 0x129   :  { %1016 = vtanh.f32 %v510_v0  ;;  %v503_v8 = vadd.f32 %v495_v1, %v1281_v43 }
 0x12a   :  { %1018 = vtanh.f32 %v509_v63 }
 0x12b   :  { %v511_v15 = vmul.f32 0.7978846, %v503_v8  ;;  %1020 = vtanh.f32 %v508_v5 }
 0x12d   :  { %1022 = vtanh.f32 %v511_v15 }
 0x12e   :  { %1024 = vtanh.f32 %v507_v13 }
 0x12f   :  { %1026 = vtanh.f32 %v506_v22 }
 0x130   :  { %1028 = vtanh.f32 %v505_v25 }
 0x131   :  { %1030 = vtanh.f32 %v504_v29  ;;  %v1003_v29 = vld [vmem:[%s1403_s3 + $0x44] ss:$8 sps:$4 sm:$0xff]  }
 0x132   :  { %1032 = vtanh.f32 %v455_v33  ;;  %v1006_v33 = vld [vmem:[%s1403_s3 + $0x34] ss:$8 sps:$4 sm:$0xff]  }
 0x133   :  { %1034 = vtanh.f32 %v454_v35  ;;  %v1007_v35 = vld [vmem:[%s1403_s3 + $0x20] ss:$8 sps:$4 sm:$0xff]  }
 0x134   :  { %1036 = vtanh.f32 %v453_v38  ;;  %v1012_v38 = vld [vmem:[%s1403_s3 + $0x14] ss:$8 sps:$4 sm:$0xff]  }
 0x135   :  { %1038 = vtanh.f32 %v452_v41  ;;  %v1013_v41 = vld [vmem:[%s1403_s3] ss:$8 sps:$4 sm:$0xff]  }
 0x136   :  { %v1017_v36 = vpop.eup %1016 }
 0x137   :  { %v1019_v39 = vpop.eup %1018  ;;  %v526_v42 = vadd.f32 1.0, %v1017_v36  ;;  %v1009_v36 = vld [vmem:[%s1403_s3 + $0x24] ss:$8 sps:$4 sm:$0xff]  }
 0x138   :  { %v1021_v40 = vpop.eup %1020  ;;  %v525_v47 = vadd.f32 1.0, %v1019_v39  ;;  %v1010_v39 = vld [vmem:[%s1403_s3 + $0x10] ss:$8 sps:$4 sm:$0xff]  }
 0x139   :  { %v534_v50 = vmul.f32 0.5, %v526_v42  ;;  %v524_v54 = vadd.f32 1.0, %v1021_v40  ;;  %v1015_v40 = vld [vmem:[%s1403_s3 + $0x4] ss:$8 sps:$4 sm:$0xff]   ;;  %v1046_v42 = vmov 0  }
 0x13a   :  { %v1023_v45 = vpop.eup %1022  ;;  %v533_v57 = vmul.f32 0.5, %v525_v47 }
 0x13b   :  { %v527_v46 = vadd.f32 1.0, %v1023_v45  ;;  %v1025_v48 = vpop.eup %1024  ;;  %v542_v60 = vmul.f32 %v534_v50, %v1266_v30  ;;  %v532_v61 = vmul.f32 0.5, %v524_v54  ;;  %v833_v54 = vsub.s32 2, %v1237_v4 }
 0x13c   :  { %v1027_v55 = vpop.eup %1026  ;;  %v523_v58 = vadd.f32 1.0, %v1025_v48  ;;  %v541_v63 = vmul.f32 %v533_v57, %v1252_v19 }
 0x13d   :  { %v535_v49 = vmul.f32 0.5, %v527_v46  ;;  %v1029_v59 = vpop.eup %1028  ;;  %v522_v62 = vadd.f32 1.0, %v1027_v55 }
 0x13e   :  { %v1031_v53 = vpop.eup %1030  ;;  %v531_v0 = vmul.f32 0.5, %v523_v58  ;;  %v521_v1 = vadd.f32 1.0, %v1029_v59 }
 0x13f   :  { %v543_v56 = vmul.f32 %v535_v49, %v1281_v43  ;;  %v1033_v2 = vpop.eup %1032  ;;  %v540_v43 = vmul.f32 %v532_v61, %v1243_v12  ;;  %v530_v3 = vmul.f32 0.5, %v522_v62  ;;  %v520_v5 = vadd.f32 1.0, %v1031_v53 }
 0x140   :  { %v1035_v6 = vpop.eup %1034  ;;  %v539_v30 = vmul.f32 %v531_v0, %v1245_v14  ;;  %v529_v7 = vmul.f32 0.5, %v521_v1  ;;  %v463_v8 = vadd.f32 1.0, %v1033_v2 }
 0x141   :  { %924 = vmatpush3.msra.mxu1 %v543_v56  ;;  %v1037_v9 = vpop.eup %1036  ;;  %v538_v19 = vmul.f32 %v530_v3, %v1250_v18  ;;  %v528_v10 = vmul.f32 0.5, %v520_v5  ;;  %v462_v11 = vadd.f32 1.0, %v1035_v6 }
 0x142   :  { %925 = vmatprep.subr.mxu1 %v1044_v52  ;;  %v1039_v13 = vpop.eup %1038  ;;  %v537_v12 = vmul.f32 %v529_v7, %v1254_v20  ;;  %v467_v15 = vmul.f32 0.5, %v463_v8  ;;  %v461_v16 = vadd.f32 1.0, %v1037_v9 }
 0x143   :  { %926 = vmatpush3.msra.mxu1 %v542_v60  ;;  %v536_v14 = vmul.f32 %v528_v10, %v1261_v27  ;;  %v466_v18 = vmul.f32 0.5, %v462_v11  ;;  %v460_v21 = vadd.f32 1.0, %v1039_v13 }
 0x144   :  { %927 = vmatprep.subr.mxu1 %v1044_v52  ;;  %v471_v22 = vmul.f32 %v467_v15, %v1268_v31  ;;  %v465_v23 = vmul.f32 0.5, %v461_v16  ;;  %v994_v31 = vld [vmem:[%s1403_s3 + $0x74] ss:$8 sps:$4 sm:$0xff]  }
 0x145   :  { %928 = vmatpush3.msra.mxu1 %v541_v63  ;;  %v470_v20 = vmul.f32 %v466_v18, %v1275_v37  ;;  %v464_v27 = vmul.f32 0.5, %v460_v21  ;;  %v544_v37 = vld [vmem:[%s1406_s4] sm:$0xff] }
 0x146   :  { %929 = vmatprep.subr.mxu1 %v1044_v52  ;;  %v469_v24 = vmul.f32 %v465_v23, %v1283_v44  ;;  %v997_v44 = vld [vmem:[%s1403_s3 + $0x64] ss:$8 sps:$4 sm:$0xff]  }
 0x147   :  { %930 = vmatpush3.msra.mxu1 %v540_v43  ;;  %v468_v25 = vmul.f32 %v464_v27, %v1292_v51  ;;  %v995_v51 = vld [vmem:[%s1403_s3 + $0x60] ss:$8 sps:$4 sm:$0xff]  }
 0x148   :  { %931 = vmatprep.subr.mxu1 %v1044_v52 }
 0x149   :  { %932 = vmatpush3.msra.mxu1 %v539_v30 }
 0x14a   :  { %933 = vmatprep.subr.mxu1 %v1044_v52 }
 0x14b   :  { %934 = vmatpush3.msra.mxu1 %v538_v19 }
 0x14c   :  { %935 = vmatprep.subr.mxu1 %v1044_v52 }
 0x14d   :  { %936 = vmatpush3.msra.mxu1 %v537_v12 }
 0x14e   :  { %937 = vmatprep.subr.mxu1 %v1044_v52 }
 0x14f   :  { %938 = vmatpush3.msra.mxu1 %v536_v14 }
 0x150   :  { %940 = vmatmul.mubr.msk.f32.vlgmr.msra.gmra.mxu1 %vm336_vm0, %v545_v17  ;;  %942 = vmatprep.subr.mxu1 %v1044_v52 }
 0x151   :  { %943 = vmatpush3.msra.mxu1 %v471_v22  ;;  %950 = vmatprep.mubr.msk.f32.mxu1 %vm1045_vm1, %v1044_v52 }
 0x152   :  { %944 = vmatprep.subr.mxu1 %v1044_v52 }
 0x153   :  { %945 = vmatpush3.msra.mxu1 %v470_v20 }
 0x154   :  { %946 = vmatprep.subr.mxu1 %v1044_v52 }
 0x155   :  { %947 = vmatpush3.msra.mxu1 %v469_v24 }
 0x156   :  { %948 = vmatprep.subr.mxu1 %v1044_v52  ;;  %v998_v52 = vld [vmem:[%s1403_s3 + $0x50] ss:$8 sps:$4 sm:$0xff]  }
 0x157   :  { %949 = vmatpush3.msra.mxu1 %v468_v25 }
 0x158   :  { %951 = vmatmul.mubr.msk.f32.vlgmr.msra.gmra.mxu1 %vm619_vm2, %v544_v37  ;;  %790 = vmatprep.subr.bf16.mxu1 %v994_v31 }
 0x159   :  { %791 = vmatpush1.bf16.msra.mxu1 %v992_v26  ;;  %822 = vmatprep.mubr.bf16.mxu1 %v1046_v42 }
 0x15a   :  { %792 = vmatprep.subr.bf16.mxu1 %v997_v44 }
 0x15d   :  { %793 = vmatpush1.bf16.msra.mxu1 %v995_v51 }
 0x15e   :  { %794 = vmatprep.subr.bf16.mxu1 %v1000_v28 }
 0x161   :  { %795 = vmatpush1.bf16.msra.mxu1 %v998_v52 }
 0x162   :  { %796 = vmatprep.subr.bf16.mxu1 %v1003_v29 }
 0x165   :  { %797 = vmatpush1.bf16.msra.mxu1 %v1001_v32 }
 0x166   :  { %798 = vmatprep.subr.bf16.mxu1 %v1006_v33 }
 0x169   :  { %799 = vmatpush1.bf16.msra.mxu1 %v1004_v34 }
 0x16a   :  { %800 = vmatprep.subr.bf16.mxu1 %v1009_v36 }
 0x16d   :  { %801 = vmatpush1.bf16.msra.mxu1 %v1007_v35 }
 0x16e   :  { %802 = vmatprep.subr.bf16.mxu1 %v1012_v38 }
 0x171   :  { %803 = vmatpush1.bf16.msra.mxu1 %v1010_v39 }
 0x172   :  { %804 = vmatprep.subr.bf16.mxu1 %v1015_v40 }
 0x175   :  { %805 = vmatpush1.bf16.msra.mxu1 %v1013_v41 }
 0x210   :  { %v615_v45 = vpop.f32.mrf.mxu1 }
 0x212   :  { %v941_v46 = vpop.f32.mrf.mxu1 }
 0x218   :  { %v689_v47 = vpop.f32.mrf.mxu1 }
 0x219   :  { %v690_v48 = vadd.f32 %v689_v47, %v615_v45 }
 0x21a   :  { %v952_v49 = vpop.f32.mrf.mxu1 }
 0x21b   :  { %v693_v50 = vpack.c.bf16 %v690_v48, %v690_v48 }
 0x21d   :  { %823 = vmatmul.mubr.bf16.vlgmr.msra.gmra.mxu1 %v693_v50 }
 0x2dd   :  { %v824_v55 = vpop.f32.mrf.mxu1 }
 0x2de   :  { %v838_v56 = vmul.f32 %v824_v55, %v824_v55 }
 0x2df   :  { %v826_v57 = vpop.f32.mrf.mxu1 }
 0x2e0   :  { %v834_v58 = vrot.slane %v826_v57, %v833_v54  ;;  %v841_v59 = vmul.f32 %v826_v57, %v826_v57  ;;  %839 = vadd.xlane.f32.xlu0 %v838_v56 }
 0x2e1   :  { %v828_v60 = vpop.f32.mrf.mxu1 }
 0x2e2   :  { %v843_v61 = vsel %vm842_vm3, %v841_v59, 0.0  ;;  %v835_v62 = vmul.f32 %v834_v58, %v824_v55 }
 0x2e3   :  { %v829_v53 = vpop.f32.mrf.mxu1 }
 0x2e4   :  { %844 = vadd.xlane.f32.xlu0 %v843_v61  ;;  %836 = vadd.xlane.f32.xlu1 %v835_v62 }
 0x369   :  { %v840_v63 = vpop.xlane.xlu0 %839 }
 0x36a   :  { %v846_v0 = vmax.f32 %v840_v63, 1e-16 }
 0x36c   :  { %1040 = vrsqrt.f32 %v846_v0 }
 0x36d   :  { %v845_v1 = vpop.xlane.xlu0 %844  ;;  %v837_v3 = vpop.xlane.xlu1 %836 }
 0x36e   :  { %v849_v2 = vmax.f32 %v845_v1, 1e-16 }
 0x370   :  { %1042 = vrsqrt.f32 %v849_v2 }
 0x379   :  { %v1041_v4 = vpop.eup %1040 }
 0x37a   :  { %v848_v6 = vmul.f32 %v1041_v4, %v837_v3 }
 0x37d   :  { %v1043_v43 = vpop.eup %1042 }
 0x37e   :  { %v854_v5 = vrot.slane %v1043_v43, %v833_v54 }
 0x380   :  { %v855_v30 = vmul.f32 %v854_v5, %v848_v6 }
 0x382   :  { %856 = vst [vmem:[%s1407_s6] sm:$0xff] %v855_v30 }

</bundles_post_ra>
